<compile_context>
chip_gen: v5e
topology: v5e:2x2
jax: 0.10.0
libtpu: 0.0.40
codegen_flags: <defaults>
</compile_context>

<pallas_src>
import functools

import jax
import jax.numpy as jnp
from jax.experimental import pallas as pl
from jax.experimental.pallas import tpu as pltpu

LANE = 128      # lane width (last dim of a vreg)
SUBLANE = 8     # f32 sublane count


def _round_up(n, m):
    return ((n + m - 1) // m) * m


def _cdiv(a, b):
    return (a + b - 1) // b


def _pad_axis(a, axis, target):
    pad = target - a.shape[axis]
    if pad <= 0:
        return a
    widths = [(0, 0)] * a.ndim
    widths[axis] = (0, pad)
    return jnp.pad(a, widths)


def mlp_kernel(x_ref, w1_ref, b1_ref, w2_ref, b2_ref, w3_ref, b3_ref, o_ref):
    # One (tb, in) batch tile; weights/biases are full (lane-padded) arrays
    # resident in VMEM. Intermediates never touch HBM.
    x = x_ref[...]
    h1 = jnp.dot(x, w1_ref[...], preferred_element_type=jnp.float32) + b1_ref[...]
    h1 = jnp.maximum(h1, 0.0)
    h2 = jnp.dot(h1, w2_ref[...], preferred_element_type=jnp.float32) + b2_ref[...]
    h2 = jnp.maximum(h2, 0.0)
    out = jnp.dot(h2, w3_ref[...], preferred_element_type=jnp.float32) + b3_ref[...]
    o_ref[...] = out.astype(o_ref.dtype)  # (tb, out_features): only real bytes hit HBM


@functools.partial(jax.jit, static_argnames=("block_b",))
def mlp_forward(x, w1, b1, w2, b2, w3, b3, block_b=1024):
    """x: (B, in). Weights stored transposed vs PyTorch: w has shape (in, out)."""
    B, in_features = x.shape
    h1_f = w1.shape[1]
    h2_f = w2.shape[1]
    out_features = w3.shape[1]

    # --- pad hidden dims to lane width (exact: zeros + ReLU(0)=0). The final
    #     projection's output dim is left unpadded so the HBM writeback is
    #     exactly out_features wide. ---
    h1_p = _round_up(h1_f, LANE)
    h2_p = _round_up(h2_f, LANE)

    w1p = _pad_axis(w1, 1, h1_p)                       # (in,   h1_p)
    b1p = _pad_axis(b1, 1, h1_p)                       # (1,    h1_p)
    w2p = _pad_axis(_pad_axis(w2, 0, h1_p), 1, h2_p)   # (h1_p, h2_p)
    b2p = _pad_axis(b2, 1, h2_p)                       # (1,    h2_p)
    w3p = _pad_axis(w3, 0, h2_p)                       # (h2_p, out_features)
    b3p = b3                                           # (1,    out_features)

    # --- batch tiling: tb rows per grid step, multiple of 8, no x padding ---
    tb = min(_round_up(block_b, SUBLANE), _round_up(B, SUBLANE))
    if B >= 2 * SUBLANE:
        # v7x: guarantee >=2 grid steps so the parallel axis uses both TCs.
        tb = min(tb, _round_up(_cdiv(B, 2), SUBLANE))
    grid = (_cdiv(B, tb),)  # ragged last tile: OOB reads row-local, OOB writes dropped

    out = pl.pallas_call(
        mlp_kernel,
        out_shape=jax.ShapeDtypeStruct((B, out_features), jnp.float32),
        grid=grid,
        in_specs=[
            # streamed batch tile
            pl.BlockSpec((tb, in_features), lambda i: (i, 0)),
            # weights / biases: constant block index -> stay VMEM-resident
            pl.BlockSpec((in_features, h1_p), lambda i: (0, 0)),
            pl.BlockSpec((1, h1_p), lambda i: (0, 0)),
            pl.BlockSpec((h1_p, h2_p), lambda i: (0, 0)),
            pl.BlockSpec((1, h2_p), lambda i: (0, 0)),
            pl.BlockSpec((h2_p, out_features), lambda i: (0, 0)),
            pl.BlockSpec((1, out_features), lambda i: (0, 0)),
        ],
        out_specs=pl.BlockSpec((tb, out_features), lambda i: (i, 0)),
        compiler_params=pltpu.CompilerParams(
            dimension_semantics=("parallel",),  # shards batch across TCs on v7x
        ),
    )(x, w1p, b1p, w2p, b2p, w3p, b3p)

    return out  # already exactly (B, out_features); no epilogue slice


def init_params(key, in_features, h1=15, h2=15, out_features=1):
    # Deterministic init mimicking nn.Linear's uniform(-1/sqrt(fan_in), 1/sqrt(fan_in)).
    ks = jax.random.split(key, 6)

    def lin(kw, kb, fan_in, fan_out):
        bound = 1.0 / jnp.sqrt(jnp.float32(fan_in))
        w = jax.random.uniform(kw, (fan_in, fan_out), jnp.float32, -bound, bound)
        b = jax.random.uniform(kb, (1, fan_out), jnp.float32, -bound, bound)
        return w, b

    w1, b1 = lin(ks[0], ks[1], in_features, h1)
    w2, b2 = lin(ks[2], ks[3], h1, h2)
    w3, b3 = lin(ks[4], ks[5], h2, out_features)
    return w1, b1, w2, b2, w3, b3


if __name__ == "__main__":
    key = jax.random.PRNGKey(0)
    k_x, k_p = jax.random.split(key)

    batch, in_features = 8, 32
    x = jax.random.normal(k_x, (batch, in_features), jnp.float32)
    w1, b1, w2, b2, w3, b3 = init_params(k_p, in_features)

    out = mlp_forward(x, w1, b1, w2, b2, w3, b3)
    out = jax.block_until_ready(out)

    # Reference check in plain JAX (same math, unpadded weights).
    ref = jnp.maximum(x @ w1 + b1, 0.0)
    ref = jnp.maximum(ref @ w2 + b2, 0.0)
    ref = ref @ w3 + b3
    assert out.shape == (batch, 1)
    assert jnp.allclose(out, ref, atol=1e-5, rtol=1e-5)

    print("KERNEL_OK")
</pallas_src>

<mosaic_0001>
module attributes {stable_mosaic.version = 11 : i64} {
  func.func @mlp_kernel(%arg0: i32, %arg1: memref<8x32xf32, #tpu.memory_space<vmem>>, %arg2: memref<32x128xf32, #tpu.memory_space<vmem>>, %arg3: memref<1x128xf32, #tpu.memory_space<vmem>>, %arg4: memref<128x128xf32, #tpu.memory_space<vmem>>, %arg5: memref<1x128xf32, #tpu.memory_space<vmem>>, %arg6: memref<128x1xf32, #tpu.memory_space<vmem>>, %arg7: memref<1x1xf32, #tpu.memory_space<vmem>>, %arg8: memref<8x1xf32, #tpu.memory_space<vmem>>) attributes {dimension_semantics = [#tpu.dimension_semantics<parallel>], iteration_bounds = array<i64: 1>, scalar_prefetch = 0 : i64, scratch_operands = 0 : i64, tpu.core_type = #tpu.core_type<tc>, window_params = [{transform_indices = @transform_0, window_bounds = array<i64: 8, 32>}, {pipeline_mode = #tpu.pipeline_mode<synchronous>, transform_indices = @transform_1, window_bounds = array<i64: 32, 128>}, {pipeline_mode = #tpu.pipeline_mode<synchronous>, transform_indices = @transform_2, window_bounds = array<i64: 1, 128>}, {pipeline_mode = #tpu.pipeline_mode<synchronous>, transform_indices = @transform_3, window_bounds = array<i64: 128, 128>}, {pipeline_mode = #tpu.pipeline_mode<synchronous>, transform_indices = @transform_4, window_bounds = array<i64: 1, 128>}, {pipeline_mode = #tpu.pipeline_mode<synchronous>, transform_indices = @transform_5, window_bounds = array<i64: 128, 1>}, {pipeline_mode = #tpu.pipeline_mode<synchronous>, transform_indices = @transform_6, window_bounds = array<i64: 1, 1>}, {transform_indices = @transform_7, window_bounds = array<i64: 8, 1>}]} {
    %c0 = arith.constant 0 : index
    %c0_0 = arith.constant 0 : index
    %0 = vector.load %arg1[%c0, %c0_0] : memref<8x32xf32, #tpu.memory_space<vmem>>, vector<8x32xf32>
    %c0_1 = arith.constant 0 : index
    %c0_2 = arith.constant 0 : index
    %1 = vector.load %arg2[%c0_1, %c0_2] : memref<32x128xf32, #tpu.memory_space<vmem>>, vector<32x128xf32>
    %cst = arith.constant dense<0.000000e+00> : vector<8x128xf32>
    %2 = tpu.matmul %0, %1, %cst {dimension_numbers = #tpu.dot_dimension_numbers<[1], [0], [0], [1], [0, 0, 1, 1], [], []>} : vector<8x32xf32>, vector<32x128xf32>, vector<8x128xf32> -> vector<8x128xf32>
    %c0_3 = arith.constant 0 : index
    %c0_4 = arith.constant 0 : index
    %3 = vector.load %arg3[%c0_3, %c0_4] : memref<1x128xf32, #tpu.memory_space<vmem>>, vector<1x128xf32>
    %4 = vector.broadcast %3 : vector<1x128xf32> to vector<8x128xf32>
    %5 = arith.addf %2, %4 : vector<8x128xf32>
    %cst_5 = arith.constant 0.000000e+00 : f32
    %6 = vector.broadcast %cst_5 : f32 to vector<8x128xf32>
    %7 = arith.maximumf %5, %6 : vector<8x128xf32>
    %c0_6 = arith.constant 0 : index
    %c0_7 = arith.constant 0 : index
    %8 = vector.load %arg4[%c0_6, %c0_7] : memref<128x128xf32, #tpu.memory_space<vmem>>, vector<128x128xf32>
    %cst_8 = arith.constant dense<0.000000e+00> : vector<8x128xf32>
    %9 = tpu.matmul %7, %8, %cst_8 {dimension_numbers = #tpu.dot_dimension_numbers<[1], [0], [0], [1], [0, 0, 1, 1], [], []>} : vector<8x128xf32>, vector<128x128xf32>, vector<8x128xf32> -> vector<8x128xf32>
    %c0_9 = arith.constant 0 : index
    %c0_10 = arith.constant 0 : index
    %10 = vector.load %arg5[%c0_9, %c0_10] : memref<1x128xf32, #tpu.memory_space<vmem>>, vector<1x128xf32>
    %11 = vector.broadcast %10 : vector<1x128xf32> to vector<8x128xf32>
    %12 = arith.addf %9, %11 : vector<8x128xf32>
    %cst_11 = arith.constant 0.000000e+00 : f32
    %13 = vector.broadcast %cst_11 : f32 to vector<8x128xf32>
    %14 = arith.maximumf %12, %13 : vector<8x128xf32>
    %c0_12 = arith.constant 0 : index
    %c0_13 = arith.constant 0 : index
    %15 = vector.load %arg6[%c0_12, %c0_13] : memref<128x1xf32, #tpu.memory_space<vmem>>, vector<128x1xf32>
    %cst_14 = arith.constant dense<0.000000e+00> : vector<8x1xf32>
    %16 = tpu.matmul %14, %15, %cst_14 {dimension_numbers = #tpu.dot_dimension_numbers<[1], [0], [0], [1], [0, 0, 1, 1], [], []>} : vector<8x128xf32>, vector<128x1xf32>, vector<8x1xf32> -> vector<8x1xf32>
    %c0_15 = arith.constant 0 : index
    %c0_16 = arith.constant 0 : index
    %17 = vector.load %arg7[%c0_15, %c0_16] : memref<1x1xf32, #tpu.memory_space<vmem>>, vector<1x1xf32>
    %18 = vector.broadcast %17 : vector<1x1xf32> to vector<8x1xf32>
    %19 = arith.addf %16, %18 : vector<8x1xf32>
    %c0_17 = arith.constant 0 : index
    %c0_18 = arith.constant 0 : index
    %20 = vector.load %arg8[%c0_17, %c0_18] : memref<8x1xf32, #tpu.memory_space<vmem>>, vector<8x1xf32>
    tpu.vector_store %arg8[%c0_17, %c0_18], %19 {strides = array<i32>} : memref<8x1xf32, #tpu.memory_space<vmem>>, vector<8x1xf32>,
    return
  }
  func.func @transform_0(%arg0: i32) -> (i32, i32) {
    %c0_i32 = arith.constant 0 : i32
    %c0_i32_0 = arith.constant 0 : i32
    return %arg0, %c0_i32 : i32, i32
  }
  func.func @transform_1(%arg0: i32) -> (i32, i32) {
    %c0_i32 = arith.constant 0 : i32
    %c0_i32_0 = arith.constant 0 : i32
    %c0_i32_1 = arith.constant 0 : i32
    return %c0_i32, %c0_i32_0 : i32, i32
  }
  func.func @transform_2(%arg0: i32) -> (i32, i32) {
    %c0_i32 = arith.constant 0 : i32
    %c0_i32_0 = arith.constant 0 : i32
    %c0_i32_1 = arith.constant 0 : i32
    return %c0_i32, %c0_i32_0 : i32, i32
  }
  func.func @transform_3(%arg0: i32) -> (i32, i32) {
    %c0_i32 = arith.constant 0 : i32
    %c0_i32_0 = arith.constant 0 : i32
    %c0_i32_1 = arith.constant 0 : i32
    return %c0_i32, %c0_i32_0 : i32, i32
  }
  func.func @transform_4(%arg0: i32) -> (i32, i32) {
    %c0_i32 = arith.constant 0 : i32
    %c0_i32_0 = arith.constant 0 : i32
    %c0_i32_1 = arith.constant 0 : i32
    return %c0_i32, %c0_i32_0 : i32, i32
  }
  func.func @transform_5(%arg0: i32) -> (i32, i32) {
    %c0_i32 = arith.constant 0 : i32
    %c0_i32_0 = arith.constant 0 : i32
    %c0_i32_1 = arith.constant 0 : i32
    return %c0_i32, %c0_i32_0 : i32, i32
  }
  func.func @transform_6(%arg0: i32) -> (i32, i32) {
    %c0_i32 = arith.constant 0 : i32
    %c0_i32_0 = arith.constant 0 : i32
    %c0_i32_1 = arith.constant 0 : i32
    return %c0_i32, %c0_i32_0 : i32, i32
  }
  func.func @transform_7(%arg0: i32) -> (i32, i32) {
    %c0_i32 = arith.constant 0 : i32
    %c0_i32_0 = arith.constant 0 : i32
    return %arg0, %c0_i32 : i32, i32
  }
}

</mosaic_0001>

<bundles_post_ra>
// kernel: mlp_forward.1
= control target key start
LH: loop header
LB: loop body
LE: loop exit
PB: predicated region body
PF: predicated region fallthrough
CT: control target
= control target key end

     0   :  { %vm37_vm0 = vcmask 261120   ;;  %vm143_vm1 = vcmask 7168   ;;  %s316_s1 = inlined_call_operand.vmem [shape: f32[32,128], index: 1, kind: input, shape index: {}]   ;;  %s317_s3 = inlined_call_operand.vmem [shape: f32[128,128], index: 3, kind: input, shape index: {}]   ;;  %s318_s0 = inlined_call_operand.vmem [shape: f32[8,32], index: 0, kind: input, shape index: {}]   ;;  %s319_s2 = inlined_call_operand.vmem [shape: f32[1,128], index: 2, kind: input, shape index: {}]   ;;  %s320_s4 = inlined_call_operand.vmem [shape: f32[1,128], index: 4, kind: input, shape index: {}]   ;;  %s321_s5 = inlined_call_operand.vmem [shape: f32[128,1], index: 5, kind: input, shape index: {}]   ;;  %s322_s6 = inlined_call_operand.<no memory space> [shape: f32[1,1], index: 6, kind: input, shape index: {}]   ;;  %s323_s7 = inlined_call_operand.vmem [shape: f32[8,1], index: 7, kind: output, shape index: {}]  }
   0x1   :  { %v32_v0 = vld [vmem:[%s316_s1 + $0x18] sm:$0xff]  ;;  %v31_v1 = vld [vmem:[%s316_s1 + $0x10] sm:$0xff]  ;;  %v30_v3 = vld [vmem:[%s316_s1 + $0x8] sm:$0xff]  ;;  %v12_v41 = vstv %s322_s6 }
   0x2   :  { %53 = vmatpush.msra.mxu0 %v32_v0  ;;  %v77_v2 = vld [vmem:[%s317_s3 + $0x78] sm:$0xff]  ;;  %v76_v4 = vld [vmem:[%s317_s3 + $0x70] sm:$0xff]  ;;  %v75_v5 = vld [vmem:[%s317_s3 + $0x68] sm:$0xff]  ;;  %13 = vst [vmem:[#allocation2] sm:$0x1] %v12_v41 }
   0x3   :  { %82 = vmatpush.msra.mxu1 %v77_v2  ;;  %v29_v6 = vld [vmem:[%s316_s1] sm:$0xff]  ;;  %v73_v9 = vld [vmem:[%s317_s3 + $0x58] sm:$0xff]  ;;  %v72_v10 = vld [vmem:[%s317_s3 + $0x50] sm:$0xff] }
   0x4   :  { %54 = vmatpush.msra.mxu0 %v31_v1  ;;  %v28_v7 = vld [vmem:[%s318_s0] sm:$0xff]  ;;  %v71_v11 = vld [vmem:[%s317_s3 + $0x48] sm:$0xff]  ;;  %v69_v13 = vld [vmem:[%s317_s3 + $0x38] sm:$0xff] }
   0x5   :  { %83 = vmatpush.msra.mxu1 %v76_v4  ;;  %v74_v8 = vld [vmem:[%s317_s3 + $0x60] sm:$0xff]  ;;  %v68_v14 = vld [vmem:[%s317_s3 + $0x30] sm:$0xff]  ;;  %v67_v15 = vld [vmem:[%s317_s3 + $0x28] sm:$0xff] }
   0x6   :  { %55 = vmatpush.msra.mxu0 %v30_v3  ;;  %v70_v12 = vld [vmem:[%s317_s3 + $0x40] sm:$0xff]  ;;  %v65_v17 = vld [vmem:[%s317_s3 + $0x18] sm:$0xff]  ;;  %v64_v18 = vld [vmem:[%s317_s3 + $0x10] sm:$0xff] }
   0x7   :  { %84 = vmatpush.msra.mxu1 %v75_v5  ;;  %v66_v16 = vld [vmem:[%s317_s3 + $0x20] sm:$0xff]  ;;  %v63_v19 = vld [vmem:[%s317_s3 + $0x8] sm:$0xff]  ;;  %v118_v21 = vld [vmem:[%s321_s5 + $0x78] sm:$0xff] }
   0x8   :  { %56 = vmatpush.msra.mxu0 %v29_v6  ;;  %v62_v20 = vld [vmem:[%s317_s3] sm:$0xff]  ;;  %v117_v22 = vld [vmem:[%s321_s5 + $0x70] sm:$0xff]  ;;  %123 = vmatpush.msra.mxu2 %v118_v21  ;;  %v116_v23 = vld [vmem:[%s321_s5 + $0x68] sm:$0xff] }
   0x9   :  { %149 = vmatmul.msk.f32.vlgmr.msra.gmra.mxu0 %vm37_vm0, %v28_v7  ;;  %85 = vmatpush.msra.mxu1 %v74_v8  ;;  %v115_v24 = vld [vmem:[%s321_s5 + $0x60] sm:$0xff]  ;;  %v114_v25 = vld [vmem:[%s321_s5 + $0x58] sm:$0xff]  ;;  %v113_v26 = vld [vmem:[%s321_s5 + $0x50] sm:$0xff] }
   0xa   :  { %124 = vmatpush.msra.mxu2 %v117_v22  ;;  %v112_v27 = vld [vmem:[%s321_s5 + $0x48] sm:$0xff]  ;;  %v111_v28 = vld [vmem:[%s321_s5 + $0x40] sm:$0xff]  ;;  %v110_v29 = vld [vmem:[%s321_s5 + $0x38] sm:$0xff] }
   0xb   :  { %86 = vmatpush.msra.mxu1 %v73_v9  ;;  %v109_v30 = vld [vmem:[%s321_s5 + $0x30] sm:$0xff]  ;;  %v108_v31 = vld [vmem:[%s321_s5 + $0x28] sm:$0xff]  ;;  %v107_v32 = vld [vmem:[%s321_s5 + $0x20] sm:$0xff] }
   0xc   :  { %125 = vmatpush.msra.mxu2 %v116_v23  ;;  %v106_v33 = vld [vmem:[%s321_s5 + $0x18] sm:$0xff]  ;;  %v150_v34 = vld [vmem:[%s319_s2] ss:$0 sm:$0xff]  ;;  %v105_v38 = vld [vmem:[%s321_s5 + $0x10] sm:$0xff] }
   0xd   :  { %87 = vmatpush.msra.mxu1 %v72_v10  ;;  %v104_v39 = vld [vmem:[%s321_s5 + $0x8] sm:$0xff]  ;;  %v103_v40 = vld [vmem:[%s321_s5] sm:$0xff] }
   0xe   :  { %126 = vmatpush.msra.mxu2 %v115_v24  ;;  %v151_v42 = vld [vmem:[%s320_s4] ss:$0 sm:$0xff] }
   0xf   :  { %88 = vmatpush.msra.mxu1 %v71_v11  ;;  %v152_v46 = vld [vmem:[#allocation2] ss:$0 sm:$0xff] }
  0x10   :  { %127 = vmatpush.msra.mxu2 %v114_v25 }
  0x11   :  { %89 = vmatpush.msra.mxu1 %v70_v12 }
  0x12   :  { %128 = vmatpush.msra.mxu2 %v113_v26 }
  0x13   :  { %90 = vmatpush.msra.mxu1 %v69_v13 }
  0x14   :  { %129 = vmatpush.msra.mxu2 %v112_v27 }
  0x15   :  { %91 = vmatpush.msra.mxu1 %v68_v14 }
  0x16   :  { %130 = vmatpush.msra.mxu2 %v111_v28 }
  0x17   :  { %92 = vmatpush.msra.mxu1 %v67_v15 }
  0x18   :  { %131 = vmatpush.msra.mxu2 %v110_v29 }
  0x19   :  { %93 = vmatpush.msra.mxu1 %v66_v16 }
  0x1a   :  { %132 = vmatpush.msra.mxu2 %v109_v30 }
  0x1b   :  { %94 = vmatpush.msra.mxu1 %v65_v17 }
  0x1c   :  { %133 = vmatpush.msra.mxu2 %v108_v31 }
  0x1d   :  { %95 = vmatpush.msra.mxu1 %v64_v18 }
  0x1e   :  { %134 = vmatpush.msra.mxu2 %v107_v32 }
  0x1f   :  { %96 = vmatpush.msra.mxu1 %v63_v19 }
  0x20   :  { %135 = vmatpush.msra.mxu2 %v106_v33 }
  0x21   :  { %97 = vmatpush.msra.mxu1 %v62_v20 }
  0x22   :  { %136 = vmatpush.msra.mxu2 %v105_v38 }
  0x24   :  { %137 = vmatpush.msra.mxu2 %v104_v39 }
  0x26   :  { %138 = vmatpush.msra.mxu2 %v103_v40 }
  0x86   :  { %v58_v35 = vpop.f32.mrf.mxu0 }
  0x87   :  { %v59_v36 = vadd.f32 %v150_v34, %v58_v35 }
  0x89   :  { %v61_v37 = vmax.f32 %v59_v36, 0.0 }
  0x8b   :  { %98 = vmatmul.f32.vlgmr.msra.gmra.mxu1 %v61_v37 }
 0x108   :  { %v99_v43 = vpop.f32.mrf.mxu1 }
 0x109   :  { %v100_v44 = vadd.f32 %v151_v42, %v99_v43 }
 0x10b   :  { %v102_v45 = vmax.f32 %v100_v44, 0.0 }
 0x10d   :  { %139 = vmatmul.f32.vlgmr.msra.gmra.mxu2 %v102_v45 }
 0x190   :  { %v140_v47 = vpop.f32.mrf.mxu2 }
 0x191   :  { %v141_v48 = vadd.f32 %v152_v46, %v140_v47 }
 0x193   :  { %144 = vst.msk [vmem:[%s323_s7] sm:$0xff] %vm143_vm1, %v141_v48 }

</bundles_post_ra>
